<compile_context>
chip_gen: v6e
topology: v6e:2x2x1
jax: 0.10.0
libtpu: 0.0.40
codegen_flags: <defaults>
</compile_context>

<pallas_src>
import functools

import jax
import jax.numpy as jnp
from jax.experimental import pallas as pl
from jax.experimental.pallas import tpu as pltpu

LANES = 128  # vreg lane width — last dim of the kernel slab.


def _copy_kernel(x_ref, o_ref):
    # Pure data-movement hot path of the view op: identity copy of one block.
    o_ref[...] = x_ref[...]


def _pick_grid(rows, lo=2, hi=8):
    """Smallest divisor of `rows` in [lo, hi]; 1 if none (single block)."""
    for g in range(lo, hi + 1):
        if rows % g == 0:
            return g
    return 1


@functools.partial(jax.jit, static_argnums=(1, 2, 3))
def shufflenet_view(x, n, h, w):
    """Equivalent of x.view(n, -1, h, w) for a contiguous input."""
    total = x.size
    c_out = total // (n * h * w)

    if total % LANES != 0:
        # TODO(synk): sizes not divisible by 128 lanes fall back to the pure
        # (free) reshape — which is also the semantically ideal lowering.
        return x.reshape(n, c_out, h, w)

    rows = total // LANES          # 539 for the module's shape
    g = _pick_grid(rows)           # 7  -> blocks of 77 rows
    block_rows = rows // g

    # Contiguous reinterpretation into a lane-dense 3-D slab (no data reorder).
    x3d = x.reshape(g, block_rows, LANES)

    out3d = pl.pallas_call(
        _copy_kernel,
        out_shape=jax.ShapeDtypeStruct((g, block_rows, LANES), x.dtype),
        grid_spec=pl.GridSpec(
            grid=(g,),
            # Block's last two dims equal the full array dims -> no (8,128)
            # padding constraint even though block_rows (77) is not 8-aligned.
            in_specs=[pl.BlockSpec((1, block_rows, LANES), lambda i: (i, 0, 0))],
            out_specs=pl.BlockSpec((1, block_rows, LANES), lambda i: (i, 0, 0)),
        ),
        # Identity copy: reuse the input HBM slab for the output.
        input_output_aliases={0: 0},
        compiler_params=pltpu.CompilerParams(
            dimension_semantics=("parallel",)),
    )(x3d)

    return out3d.reshape(n, c_out, h, w)


if __name__ == "__main__":
    key = jax.random.PRNGKey(0)
    # Shapes implied by the module's forward: x249 ~ [1, 176, 2, 14, 14].
    x249 = jax.random.normal(key, (1, 176, 2, 14, 14), dtype=jnp.float32)
    x242, x244, x245 = 1, 14, 14

    out = shufflenet_view(x249, x242, x244, x245)
    out = jax.block_until_ready(out)

    # Correctness check against the pure-JAX reference of torch .view().
    ref = x249.reshape(x242, -1, x244, x245)
    assert out.shape == (1, 352, 14, 14), out.shape
    assert out.dtype == x249.dtype
    assert bool(jnp.array_equal(out, ref))

    print("KERNEL_OK")
</pallas_src>

<mosaic_0001>
module attributes {stable_mosaic.version = 11 : i64} {
  func.func @_copy_kernel(%arg0: i32, %arg1: memref<1x77x128xf32, #tpu.memory_space<vmem>>, %arg2: memref<1x77x128xf32, #tpu.memory_space<vmem>>) attributes {dimension_semantics = [#tpu.dimension_semantics<parallel>], iteration_bounds = array<i64: 7>, scalar_prefetch = 0 : i64, scratch_operands = 0 : i64, tpu.core_type = #tpu.core_type<tc>, window_params = [{transform_indices = @transform_0, window_bounds = array<i64: 1, 77, 128>}, {transform_indices = @transform_1, window_bounds = array<i64: 1, 77, 128>}]} {
    %c0 = arith.constant 0 : index
    %c0_0 = arith.constant 0 : index
    %c0_1 = arith.constant 0 : index
    %0 = vector.load %arg1[%c0, %c0_0, %c0_1] : memref<1x77x128xf32, #tpu.memory_space<vmem>>, vector<1x77x128xf32>
    %c0_2 = arith.constant 0 : index
    %c0_3 = arith.constant 0 : index
    %c0_4 = arith.constant 0 : index
    %1 = vector.load %arg2[%c0_2, %c0_3, %c0_4] : memref<1x77x128xf32, #tpu.memory_space<vmem>>, vector<1x77x128xf32>
    tpu.vector_store %arg2[%c0_2, %c0_3, %c0_4], %0 {strides = array<i32>} : memref<1x77x128xf32, #tpu.memory_space<vmem>>, vector<1x77x128xf32>,
    return
  }
  func.func @transform_0(%arg0: i32) -> (i32, i32, i32) {
    %c0_i32 = arith.constant 0 : i32
    %c0_i32_0 = arith.constant 0 : i32
    %c0_i32_1 = arith.constant 0 : i32
    return %arg0, %c0_i32, %c0_i32_0 : i32, i32, i32
  }
  func.func @transform_1(%arg0: i32) -> (i32, i32, i32) {
    %c0_i32 = arith.constant 0 : i32
    %c0_i32_0 = arith.constant 0 : i32
    %c0_i32_1 = arith.constant 0 : i32
    return %arg0, %c0_i32, %c0_i32_0 : i32, i32, i32
  }
}

</mosaic_0001>

<bundles_post_ra>
// kernel: shufflenet_view.1
= control target key start
LH: loop header
LB: loop body
LE: loop exit
PB: predicated region body
PF: predicated region fallthrough
CT: control target
= control target key end

     0   :  { %s228_s6 = smov 0   ;;  %s245_s0 = inlined_call_operand.vmem [shape: f32[7,77,128], index: 0, kind: input, shape index: {}, may-alias: {0,1}]   ;;  %s246_s1 = inlined_call_operand.vmem [shape: f32[7,77,128], index: 1, kind: output, shape index: {}, may-alias: {0,1}]  }
   0x1 LB: > { %s192_s7 = sadd.s32 4294967295, %s216_s6   ;;  %p196_p0 = scmp.ge.s32.totalorder %s216_s6, 1  ;;  %s216_s6 = sphi %s228_s6, %s11_s6  }
   0x2   : > { %p87_p1 = scmp.lt.s32.totalorder %s216_s6, 8 }
   0x4   : > { %p88_p2 = pnand %p196_p0, %p87_p1 }
   0x5   : > { %p107_p3 = scmp.lt.s32.totalorder (!%p88_p2), %s192_s7, 6 }
   0x6   : > { %91 = sbr.rel (%p88_p2) target bundleno = 24 (0x18), region = 24 }
   0xb   : > { %s248_s7 = smov (!%p107_p3, %s192_s7), 6 }
   0xc   : > { %s201_s8 = smul.u32 80, %s248_s7 }
   0xe   : > { %s111_s11 = scalar_lea.vmem %s245_s0, %s201_s8  ;;  %s116_s14 = scalar_lea.vmem %s246_s1, %s201_s8 }
   0xf   : > { %v117_v0 = vld [vmem:[%s111_s11] sm:$0xff]  ;;  %v118_v1 = vld [vmem:[%s111_s11 + $0x8] sm:$0xff]  ;;  %v119_v2 = vld [vmem:[%s111_s11 + $0x10] sm:$0xff] }
  0x10   : > { %v120_v3 = vld [vmem:[%s111_s11 + $0x18] sm:$0xff]  ;;  %v121_v4 = vld [vmem:[%s111_s11 + $0x20] sm:$0xff]  ;;  %v122_v5 = vld [vmem:[%s111_s11 + $0x28] sm:$0xff] }
  0x11   : > { %v123_v6 = vld [vmem:[%s111_s11 + $0x30] sm:$0xff]  ;;  %v124_v7 = vld [vmem:[%s111_s11 + $0x38] sm:$0xff]  ;;  %v125_v8 = vld [vmem:[%s111_s11 + $0x40] sm:$0xff] }
  0x12   : > { %v126_v9 = vld [vmem:[%s111_s11 + $0x48] sm:$0x1f] }
  0x13   : > { %127 = vst [vmem:[%s116_s14] sm:$0xff] %v117_v0  ;;  %128 = vst [vmem:[%s116_s14 + $0x8] sm:$0xff] %v118_v1 }
  0x14   : > { %129 = vst [vmem:[%s116_s14 + $0x10] sm:$0xff] %v119_v2  ;;  %130 = vst [vmem:[%s116_s14 + $0x18] sm:$0xff] %v120_v3 }
  0x15   : > { %131 = vst [vmem:[%s116_s14 + $0x20] sm:$0xff] %v121_v4  ;;  %132 = vst [vmem:[%s116_s14 + $0x28] sm:$0xff] %v122_v5 }
  0x16   : > { %133 = vst [vmem:[%s116_s14 + $0x30] sm:$0xff] %v123_v6  ;;  %134 = vst [vmem:[%s116_s14 + $0x38] sm:$0xff] %v124_v7 }
  0x17   : > { %135 = vst [vmem:[%s116_s14 + $0x40] sm:$0xff] %v125_v8  ;;  %136 = vst [vmem:[%s116_s14 + $0x48] sm:$0x1f] %v126_v9 }
  0x18 PF: > { %s11_s6 = sadd.s32 1, %s216_s6  }
  0x19   : > { %p8_p4 = scmp.ge.s32.totalorder %s11_s6, 9  }
  0x1b   :  { %10 = sbr.rel (!%p8_p4) target bundleno = 1 (0x1), region = 54 }

</bundles_post_ra>
